<compile_context>
chip_gen: v7x
topology: tpu7x:2x2x1
jax: 0.10.0
libtpu: 0.0.40
codegen_flags: <defaults>
</compile_context>

<pallas_src>
import functools

import jax
import jax.numpy as jnp
from jax import lax
from jax.experimental import pallas as pl
from jax.experimental.pallas import tpu as pltpu


def _round_up(x, m):
    return ((x + m - 1) // m) * m


def _choose_tiles(n, row_tile, col_tile):
    """Pick (tm, tn, n_pad) with tm, tn multiples of 8 and divisors of n_pad."""
    n8 = _round_up(n, 8)
    tm = min(int(row_tile), n8)
    tm = max(8, (tm // 8) * 8)
    n_pad = _round_up(n, tm)
    tn = min(int(col_tile), n_pad)
    tn = max(8, (tn // 8) * 8)
    while n_pad % tn:
        tn -= 8
    return tm, tn, n_pad


def _infonce_kernel(z_row_ref, z_col_ref, loss_ref, acc_ref, pos_ref, *,
                    temperature, n_valid, half, matmul_dtype):
    """One (row-tile, column-tile) block of the InfoNCE loss.

    z_row_ref : (tm, D)  pre-normalized rows of the stacked [z_i; z_j]
    z_col_ref : (tn, D)  pre-normalized column block of the same array
    loss_ref  : (tm, 1)  per-row loss (written on the last column step)
    acc_ref   : (tm, 1)  VMEM scratch: running sum of masked exp(sim / t)
    pos_ref   : (tm, 1)  VMEM scratch: running positive similarity
    """
    i = pl.program_id(0)
    j = pl.program_id(1)
    inv_t = jnp.float32(1.0 / temperature)
    tm = z_row_ref.shape[0]
    tn = z_col_ref.shape[0]

    @pl.when(j == 0)
    def _():
        acc_ref[...] = jnp.zeros_like(acc_ref)
        pos_ref[...] = jnp.zeros_like(pos_ref)

    zr = z_row_ref[...]
    zc = z_col_ref[...]
    if jnp.dtype(matmul_dtype) != jnp.dtype(jnp.float32):
        zr = zr.astype(matmul_dtype)
        zc = zc.astype(matmul_dtype)

    # Similarity block: contract on the shared feature axis (no explicit .T).
    sim = lax.dot_general(zr, zc, (((1,), (1,)), ((), ())),
                          preferred_element_type=jnp.float32)     # (tm, tn)

    row_ids = i * tm + lax.broadcasted_iota(jnp.int32, (tm, tn), 0)
    col_ids = j * tn + lax.broadcasted_iota(jnp.int32, (tm, tn), 1)

    # Denominator: mask the diagonal and the padded columns *before* summing
    # (matches the PyTorch mask; avoids cancellation at small temperature).
    e = jnp.exp(sim * inv_t)
    neg_mask = (col_ids != row_ids) & (col_ids < n_valid)
    acc_ref[...] += jnp.sum(jnp.where(neg_mask, e, 0.0),
                            axis=-1, keepdims=True)

    # Positive: sim element at column (row + B) mod 2B, extracted in-tile.
    partner = jnp.where(row_ids < half, row_ids + half, row_ids - half)
    pos_mask = col_ids == partner
    pos_ref[...] += jnp.sum(jnp.where(pos_mask, sim, 0.0),
                            axis=-1, keepdims=True)

    @pl.when(j == pl.num_programs(1) - 1)
    def _():
        # -log(exp(pos/t) / denom) = log(denom) - pos/t
        loss = jnp.log(acc_ref[...]) - pos_ref[...] * inv_t
        rows = i * tm + lax.broadcasted_iota(jnp.int32, (tm, 1), 0)
        loss_ref[...] = jnp.where(rows < n_valid, loss, 0.0)


def contrastive_loss(proj_1, proj_2, temperature=0.5, row_tile=256,
                     col_tile=512, matmul_dtype=jnp.float32):
    """SimCLR / InfoNCE contrastive loss of two [batch, embedding_dim] views."""
    b, d = proj_1.shape
    n = 2 * b

    # Normalize ONCE in the wrapper (XLA fuses it with the concat), then pad
    # AFTER normalizing so padded rows/columns are exact zeros.
    z = jnp.concatenate([proj_1.astype(jnp.float32),
                         proj_2.astype(jnp.float32)], axis=0)        # (2B, D)
    z = z * lax.rsqrt(jnp.maximum(
        jnp.sum(z * z, axis=-1, keepdims=True), 1e-24))

    tm, tn, n_pad = _choose_tiles(n, row_tile, col_tile)
    if n_pad != n:
        z = jnp.pad(z, ((0, n_pad - n), (0, 0)))

    grid = (n_pad // tm, n_pad // tn)

    kernel = functools.partial(
        _infonce_kernel,
        temperature=float(temperature),
        n_valid=n,
        half=b,
        matmul_dtype=matmul_dtype,
    )

    per_row = pl.pallas_call(
        kernel,
        out_shape=jax.ShapeDtypeStruct((n_pad, 1), jnp.float32),
        grid_spec=pltpu.PrefetchScalarGridSpec(
            num_scalar_prefetch=0,
            grid=grid,
            in_specs=[
                pl.BlockSpec((tm, d), lambda i, j: (i, 0)),   # row tile
                pl.BlockSpec((tn, d), lambda i, j: (j, 0)),   # column tile
            ],
            out_specs=pl.BlockSpec((tm, 1), lambda i, j: (i, 0)),
            scratch_shapes=[
                pltpu.VMEM((tm, 1), jnp.float32),   # running sum of exp
                pltpu.VMEM((tm, 1), jnp.float32),   # running positive
            ],
        ),
        compiler_params=pltpu.CompilerParams(
            dimension_semantics=("parallel", "arbitrary")),
    )(z, z)

    return jnp.sum(per_row) / jnp.float32(n)


if __name__ == "__main__":
    batch = 8
    dim = 32
    temperature = 0.5

    key = jax.random.PRNGKey(0)
    k1, k2 = jax.random.split(key)
    proj_1 = jax.random.normal(k1, (batch, dim), dtype=jnp.float32)
    proj_2 = jax.random.normal(k2, (batch, dim), dtype=jnp.float32)

    loss = jax.jit(
        contrastive_loss,
        static_argnames=("temperature", "row_tile", "col_tile"),
    )(proj_1, proj_2, temperature=temperature)
    jax.block_until_ready(loss)

    # Reference check in plain JAX (same math as the PyTorch module).
    def ref(p1, p2):
        zz = jnp.concatenate(
            [p1 / jnp.linalg.norm(p1, axis=1, keepdims=True),
             p2 / jnp.linalg.norm(p2, axis=1, keepdims=True)], axis=0)
        sim = zz @ zz.T
        bb = p1.shape[0]
        pos = jnp.concatenate([jnp.diagonal(sim, bb), jnp.diagonal(sim, -bb)])
        nom = jnp.exp(pos / temperature)
        mask = 1.0 - jnp.eye(2 * bb)
        den = jnp.sum(mask * jnp.exp(sim / temperature), axis=1)
        return jnp.sum(-jnp.log(nom / den)) / (2 * bb)

    assert jnp.allclose(loss, ref(proj_1, proj_2), rtol=1e-5, atol=1e-5)
    print("KERNEL_OK")
</pallas_src>

<mosaic_0001>
module attributes {stable_mosaic.version = 11 : i64} {
  func.func @_infonce_kernel(%arg0: i32, %arg1: i32, %arg2: memref<16x32xf32, #tpu.memory_space<vmem>>, %arg3: memref<16x32xf32, #tpu.memory_space<vmem>>, %arg4: memref<16x1xf32, #tpu.memory_space<vmem>>, %arg5: memref<16x1xf32, #tpu.memory_space<vmem>>, %arg6: memref<16x1xf32, #tpu.memory_space<vmem>>) attributes {dimension_semantics = [#tpu.dimension_semantics<parallel>, #tpu.dimension_semantics<arbitrary>], iteration_bounds = array<i64: 1, 1>, scalar_prefetch = 0 : i64, scratch_operands = 2 : i64, tpu.core_type = #tpu.core_type<tc>, window_params = [{transform_indices = @transform_0, window_bounds = array<i64: 16, 32>}, {transform_indices = @transform_1, window_bounds = array<i64: 16, 32>}, {transform_indices = @transform_2, window_bounds = array<i64: 16, 1>}]} {
    %c0_i32 = arith.constant 0 : i32
    %0 = arith.cmpi eq, %arg1, %c0_i32 : i32
    %1 = arith.extui %0 : i1 to i32
    %c0_i32_0 = arith.constant 0 : i32
    %2 = arith.cmpi ne, %1, %c0_i32_0 : i32
    scf.if %2 {
      %cst_24 = arith.constant 0.000000e+00 : f32
      %46 = vector.broadcast %cst_24 : f32 to vector<16x1xf32>
      %c0_25 = arith.constant 0 : index
      %c0_26 = arith.constant 0 : index
      %47 = vector.load %arg5[%c0_25, %c0_26] : memref<16x1xf32, #tpu.memory_space<vmem>>, vector<16x1xf32>
      tpu.vector_store %arg5[%c0_25, %c0_26], %46 {strides = array<i32>} : memref<16x1xf32, #tpu.memory_space<vmem>>, vector<16x1xf32>,
      %cst_27 = arith.constant 0.000000e+00 : f32
      %48 = vector.broadcast %cst_27 : f32 to vector<16x1xf32>
      %c0_28 = arith.constant 0 : index
      %c0_29 = arith.constant 0 : index
      %49 = vector.load %arg6[%c0_28, %c0_29] : memref<16x1xf32, #tpu.memory_space<vmem>>, vector<16x1xf32>
      tpu.vector_store %arg6[%c0_28, %c0_29], %48 {strides = array<i32>} : memref<16x1xf32, #tpu.memory_space<vmem>>, vector<16x1xf32>,
    } else {
    }
    %c0 = arith.constant 0 : index
    %c0_1 = arith.constant 0 : index
    %3 = vector.load %arg2[%c0, %c0_1] : memref<16x32xf32, #tpu.memory_space<vmem>>, vector<16x32xf32>
    %c0_2 = arith.constant 0 : index
    %c0_3 = arith.constant 0 : index
    %4 = vector.load %arg3[%c0_2, %c0_3] : memref<16x32xf32, #tpu.memory_space<vmem>>, vector<16x32xf32>
    %cst = arith.constant dense<0.000000e+00> : vector<16x16xf32>
    %5 = tpu.matmul %3, %4, %cst {dimension_numbers = #tpu.dot_dimension_numbers<[1], [1], [0], [0], [0, 0, 1, 0], [], []>} : vector<16x32xf32>, vector<16x32xf32>, vector<16x16xf32> -> vector<16x16xf32>
    %c16_i32 = arith.constant 16 : i32
    %6 = arith.muli %arg0, %c16_i32 : i32
    %7 = tpu.iota {dimensions = array<i32: 0>} : vector<16x16xi32>
    %8 = vector.broadcast %6 : i32 to vector<16x16xi32>
    %9 = arith.addi %8, %7 : vector<16x16xi32>
    %c16_i32_4 = arith.constant 16 : i32
    %10 = arith.muli %arg1, %c16_i32_4 : i32
    %11 = tpu.iota {dimensions = array<i32: 1>} : vector<16x16xi32>
    %12 = vector.broadcast %10 : i32 to vector<16x16xi32>
    %13 = arith.addi %12, %11 : vector<16x16xi32>
    %cst_5 = arith.constant 2.000000e+00 : f32
    %14 = vector.broadcast %cst_5 : f32 to vector<16x16xf32>
    %15 = arith.mulf %5, %14 : vector<16x16xf32>
    %16 = math.exp %15 : vector<16x16xf32>
    %17 = arith.cmpi ne, %13, %9 : vector<16x16xi32>
    %c16_i32_6 = arith.constant 16 : i32
    %18 = vector.broadcast %c16_i32_6 : i32 to vector<16x16xi32>
    %19 = arith.cmpi slt, %13, %18 : vector<16x16xi32>
    %20 = arith.andi %17, %19 : vector<16x16xi1>
    %c0_7 = arith.constant 0 : index
    %c0_8 = arith.constant 0 : index
    %21 = vector.load %arg5[%c0_7, %c0_8] : memref<16x1xf32, #tpu.memory_space<vmem>>, vector<16x1xf32>
    %cst_9 = arith.constant 0.000000e+00 : f32
    %22 = vector.broadcast %cst_9 : f32 to vector<16x16xf32>
    %23 = arith.select %20, %16, %22 : vector<16x16xi1>, vector<16x16xf32>
    %cst_10 = arith.constant dense<0.000000e+00> : vector<16xf32>
    %24 = vector.multi_reduction <add>, %23, %cst_10 [1] : vector<16x16xf32> to vector<16xf32>
    %25 = vector.shape_cast %24 : vector<16xf32> to vector<16x1xf32>
    %26 = arith.addf %21, %25 : vector<16x1xf32>
    %c0_11 = arith.constant 0 : index
    %c0_12 = arith.constant 0 : index
    %27 = vector.load %arg5[%c0_11, %c0_12] : memref<16x1xf32, #tpu.memory_space<vmem>>, vector<16x1xf32>
    tpu.vector_store %arg5[%c0_11, %c0_12], %26 {strides = array<i32>} : memref<16x1xf32, #tpu.memory_space<vmem>>, vector<16x1xf32>,
    %c8_i32 = arith.constant 8 : i32
    %28 = vector.broadcast %c8_i32 : i32 to vector<16x16xi32>
    %29 = arith.cmpi slt, %9, %28 : vector<16x16xi32>
    %c8_i32_13 = arith.constant 8 : i32
    %30 = vector.broadcast %c8_i32_13 : i32 to vector<16x16xi32>
    %31 = arith.addi %9, %30 : vector<16x16xi32>
    %c8_i32_14 = arith.constant 8 : i32
    %32 = vector.broadcast %c8_i32_14 : i32 to vector<16x16xi32>
    %33 = arith.subi %9, %32 : vector<16x16xi32>
    %34 = arith.select %29, %31, %33 : vector<16x16xi1>, vector<16x16xi32>
    %35 = arith.cmpi eq, %13, %34 : vector<16x16xi32>
    %c0_15 = arith.constant 0 : index
    %c0_16 = arith.constant 0 : index
    %36 = vector.load %arg6[%c0_15, %c0_16] : memref<16x1xf32, #tpu.memory_space<vmem>>, vector<16x1xf32>
    %cst_17 = arith.constant 0.000000e+00 : f32
    %37 = vector.broadcast %cst_17 : f32 to vector<16x16xf32>
    %38 = arith.select %35, %5, %37 : vector<16x16xi1>, vector<16x16xf32>
    %cst_18 = arith.constant dense<0.000000e+00> : vector<16xf32>
    %39 = vector.multi_reduction <add>, %38, %cst_18 [1] : vector<16x16xf32> to vector<16xf32>
    %40 = vector.shape_cast %39 : vector<16xf32> to vector<16x1xf32>
    %41 = arith.addf %36, %40 : vector<16x1xf32>
    %c0_19 = arith.constant 0 : index
    %c0_20 = arith.constant 0 : index
    %42 = vector.load %arg6[%c0_19, %c0_20] : memref<16x1xf32, #tpu.memory_space<vmem>>, vector<16x1xf32>
    tpu.vector_store %arg6[%c0_19, %c0_20], %41 {strides = array<i32>} : memref<16x1xf32, #tpu.memory_space<vmem>>, vector<16x1xf32>,
    %c0_i32_21 = arith.constant 0 : i32
    %43 = arith.cmpi eq, %arg1, %c0_i32_21 : i32
    %44 = arith.extui %43 : i1 to i32
    %cst_22 = arith.constant 2.000000e+00 : f32
    %c0_i32_23 = arith.constant 0 : i32
    %45 = arith.cmpi ne, %44, %c0_i32_23 : i32
    scf.if %45 {
      %c0_24 = arith.constant 0 : index
      %c0_25 = arith.constant 0 : index
      %46 = vector.load %arg5[%c0_24, %c0_25] : memref<16x1xf32, #tpu.memory_space<vmem>>, vector<16x1xf32>
      %47 = math.log %46 : vector<16x1xf32>
      %c0_26 = arith.constant 0 : index
      %c0_27 = arith.constant 0 : index
      %48 = vector.load %arg6[%c0_26, %c0_27] : memref<16x1xf32, #tpu.memory_space<vmem>>, vector<16x1xf32>
      %49 = vector.broadcast %cst_22 : f32 to vector<16x1xf32>
      %50 = arith.mulf %48, %49 : vector<16x1xf32>
      %51 = arith.subf %47, %50 : vector<16x1xf32>
      %c16_i32_28 = arith.constant 16 : i32
      %52 = arith.muli %arg0, %c16_i32_28 : i32
      %53 = tpu.iota {dimensions = array<i32: 0>} : vector<16x1xi32>
      %54 = vector.broadcast %52 : i32 to vector<16x1xi32>
      %55 = arith.addi %54, %53 : vector<16x1xi32>
      %c16_i32_29 = arith.constant 16 : i32
      %56 = vector.broadcast %c16_i32_29 : i32 to vector<16x1xi32>
      %57 = arith.cmpi slt, %55, %56 : vector<16x1xi32>
      %cst_30 = arith.constant 0.000000e+00 : f32
      %58 = vector.broadcast %cst_30 : f32 to vector<16x1xf32>
      %59 = arith.select %57, %51, %58 : vector<16x1xi1>, vector<16x1xf32>
      %c0_31 = arith.constant 0 : index
      %c0_32 = arith.constant 0 : index
      %60 = vector.load %arg4[%c0_31, %c0_32] : memref<16x1xf32, #tpu.memory_space<vmem>>, vector<16x1xf32>
      tpu.vector_store %arg4[%c0_31, %c0_32], %59 {strides = array<i32>} : memref<16x1xf32, #tpu.memory_space<vmem>>, vector<16x1xf32>,
    } else {
    }
    return
  }
  func.func @transform_0(%arg0: i32, %arg1: i32) -> (i32, i32) {
    %c0_i32 = arith.constant 0 : i32
    %c0_i32_0 = arith.constant 0 : i32
    return %arg0, %c0_i32 : i32, i32
  }
  func.func @transform_1(%arg0: i32, %arg1: i32) -> (i32, i32) {
    %c0_i32 = arith.constant 0 : i32
    %c0_i32_0 = arith.constant 0 : i32
    return %arg1, %c0_i32 : i32, i32
  }
  func.func @transform_2(%arg0: i32, %arg1: i32) -> (i32, i32) {
    %c0_i32 = arith.constant 0 : i32
    %c0_i32_0 = arith.constant 0 : i32
    return %arg0, %c0_i32 : i32, i32
  }
}

</mosaic_0001>

<bundles_post_ra>
// kernel: contrastive_loss.1
= control target key start
LH: loop header
LB: loop body
LE: loop exit
PB: predicated region body
PF: predicated region fallthrough
CT: control target
= control target key end

     0   :  { %vm24_vm0 = vcmask 261120   ;;  %vm15_vm2 = vcmask 7168   ;;  %v232_v5 = vmov 0.0   ;;  %v113_v6 = vlaneseq  ;;  %s280_s1 = inlined_call_operand.vmem [shape: f32[16,32], index: 1, kind: input, shape index: {}, may-alias: {0,1}]   ;;  %s281_s0 = inlined_call_operand.vmem [shape: f32[16,32], index: 0, kind: input, shape index: {}, may-alias: {0,1}]   ;;  %s282_s2 = inlined_call_operand.vmem [shape: f32[16,1], index: 2, kind: output, shape index: {}]  }
   0x1   :  { %v22_v0 = vld [vmem:[%s280_s1] sm:$0xff]  ;;  %v23_v1 = vld [vmem:[%s280_s1 + $0x8] sm:$0xff]  ;;  %vm218_vm1 = vmpackc.low %vm24_vm0, %vm24_vm0  ;;  %18 = vst.msk [vmem:[#allocation3] sm:$0xff] %vm15_vm2, %v232_v5  ;;  %vm139_vm4 = vcmask 130048  }
   0x2   :  { %v217_v2 = vpack.c.bf16 %v23_v1, %v22_v0  ;;  %v20_v3 = vld [vmem:[%s281_s0] sm:$0xff]  ;;  %v21_v4 = vld [vmem:[%s281_s0 + $0x8] sm:$0xff]  ;;  %16 = vst.msk [vmem:[#allocation2] sm:$0xff] %vm15_vm2, %v232_v5  ;;  %17 = vst.msk [vmem:[#allocation2 + $0x8] sm:$0xff] %vm15_vm2, %v232_v5  ;;  %v114_v7 = vshrl.u32 %v113_v6, 7  ;;  %v121_v9 = vand.u32 127, %v113_v6 }
   0x3   :  { %214 = vmatprep.mubr.msk.f32.mxu0 %vm24_vm0, %v20_v3  ;;  %19 = vst.msk [vmem:[#allocation3 + $0x8] sm:$0xff] %vm15_vm2, %v232_v5 }
   0x4   :  { %219 = vmatprep.subr.msk.bf16.mxu0 %vm218_vm1, %v217_v2  ;;  %v115_v8 = vadd.s32 8, %v114_v7  ;;  %vm130_vm6 = vcmp.ne.s32.totalorder %v121_v9, %v114_v7  ;;  %vm132_vm7 = vcmp.lt.s32.totalorder %v121_v9, 16 }
   0x5   :  { %222 = vmatpush3.bf16.xpose.msk.msra.mxu0 %vm218_vm1, %v217_v2  ;;  %vm133_vm9 = vmand %vm130_vm6, %vm132_vm7 }
   0x6   :  { %v205_v10 = vadd.s32 4294967288, %v115_v8  ;;  %vm159_vm3 = vcmp.eq.s32.totalorder %v121_v9, %v115_v8  ;;  %vm131_vm8 = vcmp.ne.s32.totalorder %v121_v9, %v115_v8 }
   0x7   :  { %vm134_vm10 = vmand %vm131_vm8, %vm132_vm7 }
   0x8   :  { %vm160_vm5 = vcmp.eq.s32.totalorder %v121_v9, %v205_v10  ;;  %v161_v27 = vld [vmem:[#allocation3] sm:$0xff] }
   0x9   :  { %v135_v33 = vld [vmem:[#allocation2] sm:$0xff]  ;;  %v136_v36 = vld [vmem:[#allocation2 + $0x8] sm:$0xff] }
   0xa   :  { %v162_v30 = vld [vmem:[#allocation3 + $0x8] sm:$0xff] }
   0xc   :  { %215 = vmatmul.mubr.msk.f32.vlgmr.msra.gmra.mrb[0].mxu0 %vm24_vm0, %v21_v4 }
  0xdf   :  { %v216_v11 = vpop.f32.mrb[0].mxu0 }
  0xe0   :  { %v125_v12 = vmul.f32 2.0, %v216_v11  ;;  %v103_v13 = vpop.f32.mrb[1].mxu0  ;;  %v164_v19 = vsel %vm160_vm5, %v216_v11, 0.0 }
  0xe1   :  { %v124_v14 = vmul.f32 2.0, %v103_v13  ;;  %v163_v15 = vsel %vm159_vm3, %v103_v13, 0.0  ;;  %v168_v20 = vsel %vm139_vm4, %v164_v19, 0.0 }
  0xe2   :  { %v128_v16 = vmul.f32 1.442695, %v125_v12  ;;  %v165_v17 = vsel %vm139_vm4, %v163_v15, 0.0 }
  0xe3   :  { %v126_v18 = vmul.f32 1.442695, %v124_v14  ;;  %166 = vadd.xlane.f32.xlu1 %v165_v17 }
  0xe4   :  { %224 = vpow2.f32 %v128_v16 }
  0xe5   :  { %226 = vpow2.f32 %v126_v18 }
  0xe7   :  { %169 = vadd.xlane.f32.xlu1 %v168_v20 }
  0xee   :  { %v225_v21 = vpop.eup %224 }
  0xef   :  { %v227_v22 = vpop.eup %226  ;;  %v138_v25 = vsel %vm134_vm10, %v225_v21, 0.0 }
  0xf0   :  { %v137_v23 = vsel %vm133_vm9, %v227_v22, 0.0  ;;  %v143_v26 = vsel %vm139_vm4, %v138_v25, 0.0 }
  0xf1   :  { %v140_v24 = vsel %vm139_vm4, %v137_v23, 0.0 }
  0xf2   :  { %141 = vadd.xlane.f32.xlu0 %v140_v24 }
  0xf6   :  { %144 = vadd.xlane.f32.xlu0 %v143_v26 }
 0x170   :  { %v167_v28 = vpop.xlane.xlu1 %166 }
 0x171   :  { %v171_v29 = vadd.f32 %v167_v28, %v161_v27 }
 0x173   :  { %173 = vst.msk [vmem:[#allocation3] sm:$0xff] %vm15_vm2, %v171_v29 }
 0x174   :  { %v170_v31 = vpop.xlane.xlu1 %169 }
 0x175   :  { %v172_v32 = vadd.f32 %v170_v31, %v162_v30 }
 0x177   :  { %174 = vst.msk [vmem:[#allocation3 + $0x8] sm:$0xff] %vm15_vm2, %v172_v32 }
 0x17a   :  { %v184_v41 = vld [vmem:[#allocation3] sm:$0xff] }
 0x17b   :  { %v186_v43 = vmul.f32 2.0, %v184_v41 }
 0x17e   :  { %v185_v45 = vld [vmem:[#allocation3 + $0x8] sm:$0xff] }
 0x17f   :  { %v142_v34 = vpop.xlane.xlu0 %141  ;;  %v187_v48 = vmul.f32 2.0, %v185_v45 }
 0x180   :  { %v146_v35 = vadd.f32 %v142_v34, %v135_v33 }
 0x182   :  { %149 = vst.msk [vmem:[#allocation2] sm:$0xff] %vm15_vm2, %v146_v35 }
 0x183   :  { %v145_v37 = vpop.xlane.xlu0 %144 }
 0x184   :  { %v147_v38 = vadd.f32 %v145_v37, %v136_v36 }
 0x186   :  { %150 = vst.msk [vmem:[#allocation2 + $0x8] sm:$0xff] %vm15_vm2, %v147_v38 }
 0x189   :  { %v178_v39 = vld [vmem:[#allocation2] sm:$0xff] }
 0x18a   :  { %228 = vlog2.f32 %v178_v39 }
 0x18d   :  { %v179_v40 = vld [vmem:[#allocation2 + $0x8] sm:$0xff] }
 0x18e   :  { %230 = vlog2.f32 %v179_v40 }
 0x194   :  { %v229_v42 = vpop.eup %228 }
 0x195   :  { %v181_v44 = vmul.f32 0.6931472, %v229_v42 }
 0x197   :  { %v188_v46 = vsub.f32 %v181_v44, %v186_v43 }
 0x198   :  { %v231_v47 = vpop.eup %230 }
 0x199   :  { %194 = vst.msk [vmem:[%s282_s2] sm:$0xff] %vm15_vm2, %v188_v46  ;;  %v183_v49 = vmul.f32 0.6931472, %v231_v47 }
 0x19b   :  { %v189_v50 = vsub.f32 %v183_v49, %v187_v48 }
 0x19d   :  { %195 = vst.msk [vmem:[%s282_s2 + $0x8] sm:$0xff] %vm15_vm2, %v189_v50 }

</bundles_post_ra>
